<compile_context>
chip_gen: v6e
topology: v6e:2x2x1
jax: 0.10.0
libtpu: 0.0.40
codegen_flags: <defaults>
</compile_context>

<pallas_src>
import math

import jax
import jax.numpy as jnp
from jax.experimental import pallas as pl
from jax.experimental.pallas import tpu as pltpu

_MiB = 1024 * 1024
_LANE = 128                    # vreg lane width
_MAX_LANE_EXTENT = 8192        # cap on lane-dense slab width (multiple of 128)
_MIN_COPY_BYTES = 1 * _MiB     # below this, the kernel path is pure loss
_MIN_GRID_STEPS = 4            # keep >=2 (ideally >=4) blocks for v7x megacore


def _copy_kernel(x_ref, o_ref):
    # Straight pass-through copy of the current (tr, C) lane-dense tile.
    o_ref[...] = x_ref[...]


def _sublane_multiple(itemsize):
    # Sublane packing: f32 -> 8, bf16/f16 -> 16, int8/fp8 -> 32.
    return {4: 8, 2: 16, 1: 32}.get(itemsize, 8)


def _device_kind():
    try:
        return jax.devices()[0].device_kind.lower()
    except Exception:
        return ""


def _vmem_capacity_bytes():
    try:
        return int(pltpu.get_tpu_info().vmem_capacity_bytes)
    except Exception:
        return 64 * _MiB  # conservative (v7x per-TC physical VMEM)


def _block_budget_bytes():
    """Returns (target_block_bytes, pipeline_cap_bytes) for this TPU generation."""
    kind = _device_kind()
    if "v5 lite" in kind or "v5e" in kind or "v5lite" in kind:
        target, cap = 3 * _MiB, 12 * _MiB   # stay inside v5e's 16 MiB scoped default
    elif "7" in kind:
        target, cap = 6 * _MiB, 24 * _MiB   # v7x: 64 MiB physical, leave headroom
    else:
        target, cap = 8 * _MiB, 32 * _MiB   # v6e / v5p / v4 / unknown: ample VMEM
    # Safety clamp: never plan a pipeline bigger than half of physical VMEM.
    phys = _vmem_capacity_bytes()
    cap = min(cap, phys // 2)
    target = min(target, max(cap // 4, 512 * 1024))
    return target, cap


def _choose_tiling(total, itemsize):
    """View the flat tensor as (R, C) and copy it in (tr, C) lane-dense blocks.

    C is a multiple of 128 (unmasked vector stores); tr is a multiple of the
    dtype's sublane packing (or equals R).  The grid is cdiv(R, tr) — Pallas
    masks the final partial block, so tr never shrinks for awkward R.
    Returns None if no well-shaped tiling exists (caller falls back to the
    metadata-only reshape).
    """
    if total % _LANE != 0:
        return None
    C = _LANE
    while C * 2 <= _MAX_LANE_EXTENT and total % (C * 2) == 0:
        C *= 2
    R = total // C
    sub = _sublane_multiple(itemsize)
    target_block, pipeline_cap = _block_budget_bytes()
    row_bytes = C * itemsize

    tr = max(sub, (target_block // row_bytes) // sub * sub)
    # Keep the grid >= _MIN_GRID_STEPS when the shape allows (v7x megacore +
    # pipeline overlap), while staying sublane-aligned.
    if R > sub:
        tr_cap = ((pl.cdiv(R, _MIN_GRID_STEPS) + sub - 1) // sub) * sub
        tr = min(tr, max(sub, tr_cap))
    tr = min(tr, R)

    # Pipeline VMEM footprint: 2 input + 2 output double buffers.
    if 4 * tr * C * itemsize > pipeline_cap:
        tr = max(sub, (pipeline_cap // (4 * row_bytes)) // sub * sub)
        tr = min(tr, R)
        if 4 * tr * C * itemsize > pipeline_cap:
            return None
    return R, C, tr


def pallas_reshape(x, shape, *, copy=False, min_copy_bytes=_MIN_COPY_BYTES):
    """Equivalent of Reshape(*shape)(x) == x.view([x.shape[0], *shape]).

    copy=False (default): metadata-only reshape, zero HBM traffic — the
    fastest possible implementation of this module on any TPU generation.
    copy=True: materialize via a tiled Pallas HBM->VMEM->HBM copy (only used
    when the tensor is at least `min_copy_bytes`; tiny tensors fall back).
    """
    batch = x.shape[0]
    target = (batch, *shape)
    total = math.prod(x.shape)
    if math.prod(target) != total:
        raise ValueError(f"cannot reshape {x.shape} into {target}")

    itemsize = jnp.dtype(x.dtype).itemsize
    if not copy or total * itemsize < min_copy_bytes:
        return jnp.reshape(x, target)

    tiling = _choose_tiling(total, itemsize)
    if tiling is None:
        # TODO(synk): flat sizes not divisible by 128 lanes fall back to the
        # metadata-only reshape (no materialized copy on that path).
        return jnp.reshape(x, target)

    R, C, tr = tiling
    block_bytes = tr * C * itemsize
    # Scoped VMEM: 2 in + 2 out pipeline buffers plus headroom for internal
    # scratch, clamped under physical VMEM (matters on v7x's 64 MiB).
    vmem_limit = min(
        max(16 * _MiB, 4 * block_bytes + 8 * _MiB),
        max(16 * _MiB, _vmem_capacity_bytes() - 8 * _MiB),
    )

    # NOTE: assumes the default row-major layout, so this reshape is metadata
    # only and the kernel sees exactly 2*total*itemsize bytes of HBM traffic.
    x2d = jnp.reshape(x, (R, C))

    out2d = pl.pallas_call(
        _copy_kernel,
        out_shape=jax.ShapeDtypeStruct((R, C), x.dtype),
        grid_spec=pltpu.PrefetchScalarGridSpec(
            num_scalar_prefetch=0,
            grid=(pl.cdiv(R, tr),),
            in_specs=[pl.BlockSpec((tr, C), lambda i: (i, 0))],
            out_specs=pl.BlockSpec((tr, C), lambda i: (i, 0)),
        ),
        compiler_params=pltpu.CompilerParams(
            dimension_semantics=("parallel",),
            vmem_limit_bytes=int(vmem_limit),
        ),
        cost_estimate=pl.CostEstimate(
            flops=0,
            transcendentals=0,
            bytes_accessed=2 * total * itemsize,
        ),
    )(x2d)

    return jnp.reshape(out2d, target)  # final view — metadata only


if __name__ == "__main__":
    key = jax.random.PRNGKey(0)
    key_a, key_b = jax.random.split(key)

    # Small NCHW-style input: batch=2, channels=4, spatial=16x16.
    x = jax.random.normal(key_a, (2, 4, 16, 16), dtype=jnp.float32)
    ref = jnp.reshape(x, (2, 16, 64))

    # Default / recommended path: metadata-only (no kernel, no HBM traffic).
    out_fast = jax.block_until_ready(pallas_reshape(x, (16, 64)))

    # Force the Pallas copy path once on the small example (size gate off).
    out_copy = jax.block_until_ready(
        pallas_reshape(x, (16, 64), copy=True, min_copy_bytes=0))

    for out in (out_fast, out_copy):
        assert out.shape == (2, 16, 64), out.shape
        assert out.dtype == x.dtype
        assert bool(jnp.array_equal(out, ref))

    # Slightly larger copy exercise: multi-step cdiv grid with a masked
    # partial last block (R = 9 rows at C = 8192).
    y = jax.random.normal(key_b, (2, 4, 96, 96), dtype=jnp.float32)
    ref_y = jnp.reshape(y, (2, 96, 384))
    out_y = jax.block_until_ready(
        pallas_reshape(y, (96, 384), copy=True, min_copy_bytes=0))
    assert out_y.shape == (2, 96, 384), out_y.shape
    assert out_y.dtype == y.dtype
    assert bool(jnp.array_equal(out_y, ref_y))

    print("KERNEL_OK")
</pallas_src>

<mosaic_0001>
module attributes {stable_mosaic.version = 11 : i64} {
  func.func @_copy_kernel(%arg0: i32, %arg1: memref<1x2048xf32, #tpu.memory_space<vmem>>, %arg2: memref<1x2048xf32, #tpu.memory_space<vmem>>) attributes {dimension_semantics = [#tpu.dimension_semantics<parallel>], iteration_bounds = array<i64: 1>, scalar_prefetch = 0 : i64, scratch_operands = 0 : i64, tpu.core_type = #tpu.core_type<tc>, window_params = [{transform_indices = @transform_0, window_bounds = array<i64: 1, 2048>}, {transform_indices = @transform_1, window_bounds = array<i64: 1, 2048>}]} {
    %c0 = arith.constant 0 : index
    %c0_0 = arith.constant 0 : index
    %0 = vector.load %arg1[%c0, %c0_0] : memref<1x2048xf32, #tpu.memory_space<vmem>>, vector<1x2048xf32>
    %c0_1 = arith.constant 0 : index
    %c0_2 = arith.constant 0 : index
    %1 = vector.load %arg2[%c0_1, %c0_2] : memref<1x2048xf32, #tpu.memory_space<vmem>>, vector<1x2048xf32>
    tpu.vector_store %arg2[%c0_1, %c0_2], %0 {strides = array<i32>} : memref<1x2048xf32, #tpu.memory_space<vmem>>, vector<1x2048xf32>,
    return
  }
  func.func @transform_0(%arg0: i32) -> (i32, i32) {
    %c0_i32 = arith.constant 0 : i32
    %c0_i32_0 = arith.constant 0 : i32
    return %arg0, %c0_i32 : i32, i32
  }
  func.func @transform_1(%arg0: i32) -> (i32, i32) {
    %c0_i32 = arith.constant 0 : i32
    %c0_i32_0 = arith.constant 0 : i32
    return %arg0, %c0_i32 : i32, i32
  }
}

</mosaic_0001>

<bundles_post_ra>
// kernel: tpu_custom_call.1
= control target key start
LH: loop header
LB: loop body
LE: loop exit
PB: predicated region body
PF: predicated region fallthrough
CT: control target
= control target key end

     0   :  { %6 = vsyncpa [#allocation3], 0  ;;  %s104_s0 = inlined_call_operand.hbm [shape: f32[1,2048], index: 0, kind: input, shape index: {}]   ;;  %s105_s1 = inlined_call_operand.hbm [shape: f32[1,2048], index: 1, kind: output, shape index: {}]  }
   0x1   :  { %7 = vsyncpa [#allocation4], 0  ;;  %s86_s6 = smov [#allocation2]  }
   0x2   :  { %s14_s7 = sshll.u32 %s86_s6, 4  ;;  %s15_s7 = int_to_ptr.vmem [resolvable:$true] %s14_s7 }
   0x3   :  { %s50_s8 = scalar_lea.vmem %s15_s7, 256  ;;  %p55_p1 = scmp.lt.s32.totalorder %s15_s7, %s15_s7 }
   0x4   :  { %p51_p0 = scmp.ne.s32.totalorder %s15_s7, %s50_s8  ;;  %p56_p2 = scmp.lt.s32.totalorder %s50_s8, %s50_s8 }
   0x6   :  { %p57_p3 = por %p56_p2, %p55_p1 }
   0x8   :  { %p58_p4 = pnand %p57_p3, %p51_p0 }
   0xa   :  { %61 = shalt.err (!%p58_p4)
}
   0xb   :  { %17 = dma.hbm_to_vmem [thread:$0]  %s104_s0, 256, %s15_s7, [#allocation3]  }
   0xc   :  { %82 = dma.done.wait [#allocation3], 256  }
   0xd   :  { %83 = vsyncadd [#allocation3], 4294967040  ;;  %s87_s11 = smov [#allocation5]   ;;  %v21_v0 = vld [vmem:[#allocation2] sm:$0xff]  ;;  %v22_v1 = vld [vmem:[#allocation2 + $0x8] sm:$0xff] }
   0xe   :  { %s31_s12 = sshll.u32 %s87_s11, 4  ;;  %23 = vst [vmem:[#allocation5] sm:$0xff] %v21_v0  ;;  %24 = vst [vmem:[#allocation5 + $0x8] sm:$0xff] %v22_v1  ;;  %s32_s12 = int_to_ptr.vmem [resolvable:$true] %s31_s12 }
   0xf   :  { %s62_s13 = scalar_lea.vmem %s32_s12, 256  ;;  %p67_p6 = scmp.lt.s32.totalorder %s32_s12, %s32_s12 }
  0x10   :  { %p63_p5 = scmp.ne.s32.totalorder %s32_s12, %s62_s13  ;;  %p68_p7 = scmp.lt.s32.totalorder %s62_s13, %s62_s13 }
  0x12   :  { %p69_p8 = por %p68_p7, %p67_p6 }
  0x14   :  { %p70_p9 = pnand %p69_p8, %p63_p5 }
  0x16   :  { %73 = shalt.err (!%p70_p9)
}
  0x17   :  { %34 = dma.vmem_to_hbm [thread:$0]  %s32_s12, 256, %s105_s1, [#allocation4]  }
  0x18   :  { %84 = dma.done.wait [#allocation4], 256  }
  0x19   :  { %85 = vsyncadd [#allocation4], 4294967040 }
  0x1a   :  { %38 = vsyncpa [#allocation3], 1 }
  0x1b   :  { %39 = vsyncpa [#allocation4], 1 }

</bundles_post_ra>
